<compile_context>
chip_gen: v5e
topology: v5e:2x2
jax: 0.10.0
libtpu: 0.0.40
codegen_flags: <defaults>
</compile_context>

<pallas_src>
import math
import functools

import jax
import jax.numpy as jnp
from jax import lax
from jax.experimental import pallas as pl
from jax.experimental.pallas import tpu as pltpu


# -----------------------------------------------------------------------------
# Kernel 1: fused QKV projection    y = x @ Wqkv + bqkv   ->   bf16 (B, S, 3*H*dh)
# -----------------------------------------------------------------------------
def _qkv_proj_kernel(x_ref, wqkv_ref, bqkv_ref, o_ref):
    x = x_ref[0].astype(wqkv_ref.dtype)                        # (s_t, D) bf16
    y = jnp.dot(x, wqkv_ref[...], preferred_element_type=jnp.float32)
    y = y + bqkv_ref[...]                                      # f32 bias add
    o_ref[0] = y.astype(o_ref.dtype)                           # lane-dense bf16 write


# -----------------------------------------------------------------------------
# Kernel 2: flash attention (online softmax over KV tiles) + fused output proj
# -----------------------------------------------------------------------------
def _flash_attn_kernel(q_ref, k_ref, v_ref, wo_ref, bo_ref, o_ref,
                       m_s, l_s, acc_s):
    qi = pl.program_id(1)
    ki = pl.program_id(2)
    nk = pl.num_programs(2)

    q_tile = q_ref.shape[2]
    kv_tile = k_ref.shape[2]

    @pl.when(ki == 0)
    def _init():
        m_s[...] = jnp.full(m_s.shape, -jnp.inf, dtype=jnp.float32)
        l_s[...] = jnp.zeros(l_s.shape, dtype=jnp.float32)
        acc_s[...] = jnp.zeros(acc_s.shape, dtype=jnp.float32)

    # Causal tile skip: KV tiles strictly above the diagonal contribute nothing.
    q_last_row = qi * q_tile + (q_tile - 1)
    kv_first_col = ki * kv_tile

    @pl.when(kv_first_col <= q_last_row)
    def _compute():
        q = q_ref[0]                                  # (H, q_t, dh) bf16, pre-scaled
        k = k_ref[0]
        v = v_ref[0]

        # Head-batched scores; K consumed in stored layout (no explicit .T).
        s = jnp.einsum("hqd,hkd->hqk", q, k,
                       preferred_element_type=jnp.float32)     # (H, q_t, kv_t) f32

        # Global causal mask. For fully-below-diagonal tiles this is an all-true
        # select (single cheap VPU op); only the diagonal tile actually masks.
        row = qi * q_tile + lax.broadcasted_iota(jnp.int32, (q_tile, kv_tile), 0)
        col = ki * kv_tile + lax.broadcasted_iota(jnp.int32, (q_tile, kv_tile), 1)
        s = jnp.where((col <= row)[None, :, :], s, jnp.float32(-1e30))

        # Online softmax update (f32 math; bf16 only as MXU operand).
        m_new = jnp.maximum(m_s[...], jnp.max(s, axis=-1, keepdims=True))
        alpha = jnp.exp(m_s[...] - m_new)
        p = jnp.exp(s - m_new)
        l_s[...] = alpha * l_s[...] + jnp.sum(p, axis=-1, keepdims=True)
        acc_s[...] = alpha * acc_s[...] + jnp.einsum(
            "hqk,hkd->hqd", p.astype(v.dtype), v,
            preferred_element_type=jnp.float32)
        m_s[...] = m_new

    @pl.when(ki == nk - 1)
    def _finalize():
        # Normalize with EUP reciprocal, then fused output projection.
        ctx = acc_s[...] * pl.reciprocal(l_s[...], approx=True)     # (H, q_t, dh) f32
        yh = jnp.einsum("hqd,hdn->hqn", ctx.astype(wo_ref.dtype), wo_ref[...],
                        preferred_element_type=jnp.float32)         # (H, q_t, D) f32
        y = jnp.sum(yh, axis=0) + bo_ref[...]                       # (q_t, D)
        o_ref[0] = y.astype(o_ref.dtype)


def _pick_tile(n, target):
    if n <= target:
        return n
    assert n % target == 0, f"length {n} must be a multiple of tile {target}"
    return target


@functools.partial(jax.jit, static_argnames=("n_head", "d_head"))
def rel_multihead_attn_forward(x, params, *, n_head, d_head):
    """x: (B, S, d_model) float32. Weights are stored as (in, out) = W^T so the
    kernels compute x @ W + b (== PyTorch nn.Linear)."""
    B, S, D = x.shape
    Dh = n_head * d_head
    scale = 1.0 / math.sqrt(d_head)

    # --- host-side parameter packing (fold softmax scale into Wq / bq) ----------
    wqkv = jnp.concatenate([params["wq"] * scale, params["wk"], params["wv"]],
                           axis=1).astype(jnp.bfloat16)              # (D, 3*Dh)
    bqkv = jnp.concatenate([params["bq"] * scale, params["bk"], params["bv"]],
                           axis=1).astype(jnp.float32)               # (1, 3*Dh)
    wo3 = params["wo"].reshape(n_head, d_head, D).astype(jnp.bfloat16)
    bo = params["bo"].astype(jnp.float32)                            # (1, D)

    # --- kernel 1: fused QKV projection -----------------------------------------
    s_tile = _pick_tile(S, 256)
    proj_cost = pl.CostEstimate(
        flops=2 * B * S * D * 3 * Dh,
        transcendentals=0,
        bytes_accessed=B * S * D * 4 + D * 3 * Dh * 2 + 3 * Dh * 4 + B * S * 3 * Dh * 2)
    qkv = pl.pallas_call(
        _qkv_proj_kernel,
        out_shape=jax.ShapeDtypeStruct((B, S, 3 * Dh), jnp.bfloat16),
        grid_spec=pltpu.PrefetchScalarGridSpec(
            num_scalar_prefetch=0,
            grid=(B, S // s_tile),
            in_specs=[
                pl.BlockSpec((1, s_tile, D), lambda b, si: (b, si, 0)),
                pl.BlockSpec((D, 3 * Dh), lambda b, si: (0, 0)),      # resident weight
                pl.BlockSpec((1, 3 * Dh), lambda b, si: (0, 0)),      # resident bias
            ],
            out_specs=pl.BlockSpec((1, s_tile, 3 * Dh), lambda b, si: (b, si, 0)),
        ),
        compiler_params=pltpu.CompilerParams(
            dimension_semantics=("parallel", "parallel"),
            vmem_limit_bytes=64 * 1024 * 1024),
        cost_estimate=proj_cost,
    )(x, wqkv, bqkv)

    # --- layout plumbing (outside the kernels): head-major (B, H, S, dh) bf16 ----
    qkv = qkv.reshape(B, S, 3, n_head, d_head)
    q = jnp.transpose(qkv[:, :, 0], (0, 2, 1, 3))
    k = jnp.transpose(qkv[:, :, 1], (0, 2, 1, 3))
    v = jnp.transpose(qkv[:, :, 2], (0, 2, 1, 3))

    # --- kernel 2: flash attention + output projection ---------------------------
    q_tile = _pick_tile(S, 128)
    kv_tile = _pick_tile(S, 128)
    num_q, num_kv = S // q_tile, S // kv_tile
    attn_cost = pl.CostEstimate(
        flops=4 * B * n_head * S * S * d_head + 2 * B * S * Dh * D,
        transcendentals=B * n_head * S * S,
        bytes_accessed=(3 * B * n_head * S * d_head * 2 * max(num_q, num_kv)
                        + B * S * D * 4 + n_head * d_head * D * 2 + D * 4))
    out = pl.pallas_call(
        _flash_attn_kernel,
        out_shape=jax.ShapeDtypeStruct((B, S, D), x.dtype),
        grid_spec=pltpu.PrefetchScalarGridSpec(
            num_scalar_prefetch=0,
            grid=(B, num_q, num_kv),
            in_specs=[
                pl.BlockSpec((1, n_head, q_tile, d_head), lambda b, i, j: (b, 0, i, 0)),
                pl.BlockSpec((1, n_head, kv_tile, d_head), lambda b, i, j: (b, 0, j, 0)),
                pl.BlockSpec((1, n_head, kv_tile, d_head), lambda b, i, j: (b, 0, j, 0)),
                pl.BlockSpec((n_head, d_head, D), lambda b, i, j: (0, 0, 0)),  # resident
                pl.BlockSpec((1, D), lambda b, i, j: (0, 0)),                  # resident
            ],
            out_specs=pl.BlockSpec((1, q_tile, D), lambda b, i, j: (b, i, 0)),
            scratch_shapes=[
                pltpu.VMEM((n_head, q_tile, 1), jnp.float32),        # running max
                pltpu.VMEM((n_head, q_tile, 1), jnp.float32),        # running sum
                pltpu.VMEM((n_head, q_tile, d_head), jnp.float32),   # accumulator
            ],
        ),
        compiler_params=pltpu.CompilerParams(
            dimension_semantics=("parallel", "parallel", "arbitrary"),
            vmem_limit_bytes=64 * 1024 * 1024),
        cost_estimate=attn_cost,
    )(q, k, v, wo3, bo)
    return out


def _init_params(key, d_model, n_head, d_head):
    """nn.Linear-style uniform(-1/sqrt(fan_in), 1/sqrt(fan_in)) init; weights stored
    pre-transposed as (in, out)."""
    Dh = n_head * d_head
    b_in = 1.0 / math.sqrt(d_model)
    b_out = 1.0 / math.sqrt(Dh)
    ks = jax.random.split(key, 8)
    u = lambda k, shape, bound: jax.random.uniform(k, shape, jnp.float32, -bound, bound)
    return {
        "wq": u(ks[0], (d_model, Dh), b_in), "bq": u(ks[1], (1, Dh), b_in),
        "wk": u(ks[2], (d_model, Dh), b_in), "bk": u(ks[3], (1, Dh), b_in),
        "wv": u(ks[4], (d_model, Dh), b_in), "bv": u(ks[5], (1, Dh), b_in),
        "wo": u(ks[6], (Dh, d_model), b_out), "bo": u(ks[7], (1, d_model), b_out),
    }


def _reference(x, params, n_head, d_head):
    """Pure-JAX f32 reference mirroring the forward (eval mode)."""
    B, S, D = x.shape
    def proj(w, b):
        y = x @ w + b
        return y.reshape(B, S, n_head, d_head).transpose(0, 2, 1, 3)
    q = proj(params["wq"], params["bq"])
    k = proj(params["wk"], params["bk"])
    v = proj(params["wv"], params["bv"])
    scores = jnp.einsum("bhqd,bhkd->bhqk", q, k) / math.sqrt(d_head)
    mask = jnp.tril(jnp.ones((S, S), dtype=bool))
    scores = jnp.where(mask[None, None], scores, -1e30)
    p = jax.nn.softmax(scores, axis=-1)
    ctx = jnp.einsum("bhqk,bhkd->bhqd", p, v)
    ctx = ctx.transpose(0, 2, 1, 3).reshape(B, S, n_head * d_head)
    return ctx @ params["wo"] + params["bo"]


if __name__ == "__main__":
    B, S, D_MODEL, N_HEAD, D_HEAD = 2, 8, 32, 4, 8   # d_model=32, 4 heads, d_head=8

    key = jax.random.PRNGKey(0)
    kx, kp = jax.random.split(key)
    x = jax.random.normal(kx, (B, S, D_MODEL), dtype=jnp.float32)
    params = _init_params(kp, D_MODEL, N_HEAD, D_HEAD)

    out = rel_multihead_attn_forward(x, params, n_head=N_HEAD, d_head=D_HEAD)
    out = jax.block_until_ready(out)

    ref = _reference(x, params, N_HEAD, D_HEAD)
    assert out.shape == (B, S, D_MODEL)
    # bf16 matmul operands + approximate reciprocal -> relaxed tolerance vs f32 ref.
    assert jnp.allclose(out, ref, atol=5e-2, rtol=5e-2), "mismatch vs reference"

    print("KERNEL_OK")
</pallas_src>

<mosaic_0001>
module attributes {stable_mosaic.version = 11 : i64} {
  func.func @_qkv_proj_kernel(%arg0: i32, %arg1: i32, %arg2: memref<1x8x32xf32, #tpu.memory_space<vmem>>, %arg3: memref<32x96xbf16, #tpu.memory_space<vmem>>, %arg4: memref<1x96xf32, #tpu.memory_space<vmem>>, %arg5: memref<1x8x96xbf16, #tpu.memory_space<vmem>>) attributes {dimension_semantics = [#tpu.dimension_semantics<parallel>, #tpu.dimension_semantics<parallel>], iteration_bounds = array<i64: 2, 1>, scalar_prefetch = 0 : i64, scratch_operands = 0 : i64, tpu.core_type = #tpu.core_type<tc>, window_params = [{transform_indices = @transform_0, window_bounds = array<i64: 1, 8, 32>}, {pipeline_mode = #tpu.pipeline_mode<synchronous>, transform_indices = @transform_1, window_bounds = array<i64: 32, 96>}, {pipeline_mode = #tpu.pipeline_mode<synchronous>, transform_indices = @transform_2, window_bounds = array<i64: 1, 96>}, {transform_indices = @transform_3, window_bounds = array<i64: 1, 8, 96>}]} {
    %c0 = arith.constant 0 : index
    %c0_0 = arith.constant 0 : index
    %c0_1 = arith.constant 0 : index
    %0 = vector.load %arg2[%c0, %c0_0, %c0_1] : memref<1x8x32xf32, #tpu.memory_space<vmem>>, vector<1x8x32xf32>
    %1 = vector.shape_cast %0 : vector<1x8x32xf32> to vector<8x32xf32>
    %2 = arith.truncf %1 : vector<8x32xf32> to vector<8x32xbf16>
    %c0_2 = arith.constant 0 : index
    %c0_3 = arith.constant 0 : index
    %3 = vector.load %arg3[%c0_2, %c0_3] : memref<32x96xbf16, #tpu.memory_space<vmem>>, vector<32x96xbf16>
    %cst = arith.constant dense<0.000000e+00> : vector<8x96xf32>
    %4 = tpu.matmul %2, %3, %cst {dimension_numbers = #tpu.dot_dimension_numbers<[1], [0], [0], [1], [0, 0, 1, 1], [], []>} : vector<8x32xbf16>, vector<32x96xbf16>, vector<8x96xf32> -> vector<8x96xf32>
    %c0_4 = arith.constant 0 : index
    %c0_5 = arith.constant 0 : index
    %5 = vector.load %arg4[%c0_4, %c0_5] : memref<1x96xf32, #tpu.memory_space<vmem>>, vector<1x96xf32>
    %6 = vector.broadcast %5 : vector<1x96xf32> to vector<8x96xf32>
    %7 = arith.addf %4, %6 : vector<8x96xf32>
    %8 = arith.truncf %7 : vector<8x96xf32> to vector<8x96xbf16>
    %c0_6 = arith.constant 0 : index
    %c0_7 = arith.constant 0 : index
    %c0_8 = arith.constant 0 : index
    %9 = vector.load %arg5[%c0_6, %c0_7, %c0_8] : memref<1x8x96xbf16, #tpu.memory_space<vmem>>, vector<1x8x96xbf16>
    %10 = vector.shape_cast %9 : vector<1x8x96xbf16> to vector<8x96xbf16>
    %11 = vector.shape_cast %8 : vector<8x96xbf16> to vector<1x8x96xbf16>
    tpu.vector_store %arg5[%c0_6, %c0_7, %c0_8], %11 {strides = array<i32>} : memref<1x8x96xbf16, #tpu.memory_space<vmem>>, vector<1x8x96xbf16>,
    return
  }
  func.func @transform_0(%arg0: i32, %arg1: i32) -> (i32, i32, i32) {
    %c0_i32 = arith.constant 0 : i32
    %c0_i32_0 = arith.constant 0 : i32
    return %arg0, %arg1, %c0_i32 : i32, i32, i32
  }
  func.func @transform_1(%arg0: i32, %arg1: i32) -> (i32, i32) {
    %c0_i32 = arith.constant 0 : i32
    %c0_i32_0 = arith.constant 0 : i32
    %c0_i32_1 = arith.constant 0 : i32
    return %c0_i32, %c0_i32_0 : i32, i32
  }
  func.func @transform_2(%arg0: i32, %arg1: i32) -> (i32, i32) {
    %c0_i32 = arith.constant 0 : i32
    %c0_i32_0 = arith.constant 0 : i32
    %c0_i32_1 = arith.constant 0 : i32
    return %c0_i32, %c0_i32_0 : i32, i32
  }
  func.func @transform_3(%arg0: i32, %arg1: i32) -> (i32, i32, i32) {
    %c0_i32 = arith.constant 0 : i32
    %c0_i32_0 = arith.constant 0 : i32
    return %arg0, %arg1, %c0_i32 : i32, i32, i32
  }
}

module attributes {stable_mosaic.version = 11 : i64} {
  func.func @_flash_attn_kernel(%arg0: i32, %arg1: i32, %arg2: i32, %arg3: memref<1x4x8x8xbf16, #tpu.memory_space<vmem>>, %arg4: memref<1x4x8x8xbf16, #tpu.memory_space<vmem>>, %arg5: memref<1x4x8x8xbf16, #tpu.memory_space<vmem>>, %arg6: memref<4x8x32xbf16, #tpu.memory_space<vmem>>, %arg7: memref<1x32xf32, #tpu.memory_space<vmem>>, %arg8: memref<1x8x32xf32, #tpu.memory_space<vmem>>, %arg9: memref<4x8x1xf32, #tpu.memory_space<vmem>>, %arg10: memref<4x8x1xf32, #tpu.memory_space<vmem>>, %arg11: memref<4x8x8xf32, #tpu.memory_space<vmem>>) attributes {dimension_semantics = [#tpu.dimension_semantics<parallel>, #tpu.dimension_semantics<parallel>, #tpu.dimension_semantics<arbitrary>], iteration_bounds = array<i64: 2, 1, 1>, scalar_prefetch = 0 : i64, scratch_operands = 3 : i64, tpu.core_type = #tpu.core_type<tc>, window_params = [{transform_indices = @transform_0, window_bounds = array<i64: 1, 4, 8, 8>}, {transform_indices = @transform_1, window_bounds = array<i64: 1, 4, 8, 8>}, {transform_indices = @transform_2, window_bounds = array<i64: 1, 4, 8, 8>}, {pipeline_mode = #tpu.pipeline_mode<synchronous>, transform_indices = @transform_3, window_bounds = array<i64: 4, 8, 32>}, {pipeline_mode = #tpu.pipeline_mode<synchronous>, transform_indices = @transform_4, window_bounds = array<i64: 1, 32>}, {transform_indices = @transform_5, window_bounds = array<i64: 1, 8, 32>}]} {
    %c0_i32 = arith.constant 0 : i32
    %0 = arith.cmpi eq, %arg2, %c0_i32 : i32
    %1 = arith.extui %0 : i1 to i32
    %c0_i32_0 = arith.constant 0 : i32
    %2 = arith.cmpi ne, %1, %c0_i32_0 : i32
    scf.if %2 {
      %cst = arith.constant 0xFF800000 : f32
      %12 = vector.broadcast %cst : f32 to vector<4x8x1xf32>
      %c0 = arith.constant 0 : index
      %c0_5 = arith.constant 0 : index
      %c0_6 = arith.constant 0 : index
      %13 = vector.load %arg9[%c0, %c0_5, %c0_6] : memref<4x8x1xf32, #tpu.memory_space<vmem>>, vector<4x8x1xf32>
      tpu.vector_store %arg9[%c0, %c0_5, %c0_6], %12 {strides = array<i32>} : memref<4x8x1xf32, #tpu.memory_space<vmem>>, vector<4x8x1xf32>,
      %cst_7 = arith.constant 0.000000e+00 : f32
      %14 = vector.broadcast %cst_7 : f32 to vector<4x8x1xf32>
      %c0_8 = arith.constant 0 : index
      %c0_9 = arith.constant 0 : index
      %c0_10 = arith.constant 0 : index
      %15 = vector.load %arg10[%c0_8, %c0_9, %c0_10] : memref<4x8x1xf32, #tpu.memory_space<vmem>>, vector<4x8x1xf32>
      tpu.vector_store %arg10[%c0_8, %c0_9, %c0_10], %14 {strides = array<i32>} : memref<4x8x1xf32, #tpu.memory_space<vmem>>, vector<4x8x1xf32>,
      %cst_11 = arith.constant 0.000000e+00 : f32
      %16 = vector.broadcast %cst_11 : f32 to vector<4x8x8xf32>
      %c0_12 = arith.constant 0 : index
      %c0_13 = arith.constant 0 : index
      %c0_14 = arith.constant 0 : index
      %17 = vector.load %arg11[%c0_12, %c0_13, %c0_14] : memref<4x8x8xf32, #tpu.memory_space<vmem>>, vector<4x8x8xf32>
      tpu.vector_store %arg11[%c0_12, %c0_13, %c0_14], %16 {strides = array<i32>} : memref<4x8x8xf32, #tpu.memory_space<vmem>>, vector<4x8x8xf32>,
    } else {
    }
    %c8_i32 = arith.constant 8 : i32
    %3 = arith.muli %arg1, %c8_i32 : i32
    %c7_i32 = arith.constant 7 : i32
    %4 = arith.addi %3, %c7_i32 : i32
    %c8_i32_1 = arith.constant 8 : i32
    %5 = arith.muli %arg2, %c8_i32_1 : i32
    %6 = arith.cmpi sle, %5, %4 : i32
    %7 = arith.extui %6 : i1 to i32
    %c0_i32_2 = arith.constant 0 : i32
    %8 = arith.cmpi ne, %7, %c0_i32_2 : i32
    scf.if %8 {
      %c0 = arith.constant 0 : index
      %c0_5 = arith.constant 0 : index
      %c0_6 = arith.constant 0 : index
      %c0_7 = arith.constant 0 : index
      %12 = vector.load %arg3[%c0, %c0_5, %c0_6, %c0_7] : memref<1x4x8x8xbf16, #tpu.memory_space<vmem>>, vector<1x4x8x8xbf16>
      %13 = vector.shape_cast %12 : vector<1x4x8x8xbf16> to vector<4x8x8xbf16>
      %c0_8 = arith.constant 0 : index
      %c0_9 = arith.constant 0 : index
      %c0_10 = arith.constant 0 : index
      %c0_11 = arith.constant 0 : index
      %14 = vector.load %arg4[%c0_8, %c0_9, %c0_10, %c0_11] : memref<1x4x8x8xbf16, #tpu.memory_space<vmem>>, vector<1x4x8x8xbf16>
      %15 = vector.shape_cast %14 : vector<1x4x8x8xbf16> to vector<4x8x8xbf16>
      %c0_12 = arith.constant 0 : index
      %c0_13 = arith.constant 0 : index
      %c0_14 = arith.constant 0 : index
      %c0_15 = arith.constant 0 : index
      %16 = vector.load %arg5[%c0_12, %c0_13, %c0_14, %c0_15] : memref<1x4x8x8xbf16, #tpu.memory_space<vmem>>, vector<1x4x8x8xbf16>
      %17 = vector.shape_cast %16 : vector<1x4x8x8xbf16> to vector<4x8x8xbf16>
      "tpu.trace_start"() <{level = 10 : i32, message = "hqd,hkd->hqk"}> : () -> ()
      %cst = arith.constant dense<0.000000e+00> : vector<4x8x8xf32>
      %18 = tpu.matmul %13, %15, %cst {dimension_numbers = #tpu.dot_dimension_numbers<[2], [2], [1], [1], [0, 0, 0, 1, 1, 1], [0], [0]>} : vector<4x8x8xbf16>, vector<4x8x8xbf16>, vector<4x8x8xf32> -> vector<4x8x8xf32>
      "tpu.trace_stop"() : () -> ()
      %c8_i32_16 = arith.constant 8 : i32
      %19 = arith.muli %arg1, %c8_i32_16 : i32
      %20 = tpu.iota {dimensions = array<i32: 0>} : vector<8x8xi32>
      %21 = vector.broadcast %19 : i32 to vector<8x8xi32>
      %22 = arith.addi %21, %20 : vector<8x8xi32>
      %c8_i32_17 = arith.constant 8 : i32
      %23 = arith.muli %arg2, %c8_i32_17 : i32
      %24 = tpu.iota {dimensions = array<i32: 1>} : vector<8x8xi32>
      %25 = vector.broadcast %23 : i32 to vector<8x8xi32>
      %26 = arith.addi %25, %24 : vector<8x8xi32>
      %27 = arith.cmpi sle, %26, %22 : vector<8x8xi32>
      %28 = vector.shape_cast %27 : vector<8x8xi1> to vector<1x8x8xi1>
      %cst_18 = arith.constant -1.000000e+30 : f32
      %29 = vector.shape_cast %28 : vector<1x8x8xi1> to vector<1x8x8xi1>
      %30 = vector.broadcast %29 : vector<1x8x8xi1> to vector<4x8x8xi1>
      %31 = vector.broadcast %cst_18 : f32 to vector<4x8x8xf32>
      %32 = arith.select %30, %18, %31 : vector<4x8x8xi1>, vector<4x8x8xf32>
      %c0_19 = arith.constant 0 : index
      %c0_20 = arith.constant 0 : index
      %c0_21 = arith.constant 0 : index
      %33 = vector.load %arg9[%c0_19, %c0_20, %c0_21] : memref<4x8x1xf32, #tpu.memory_space<vmem>>, vector<4x8x1xf32>
      %cst_22 = arith.constant dense<0xFF800000> : vector<4x8xf32>
      %34 = vector.multi_reduction <maximumf>, %32, %cst_22 [2] : vector<4x8x8xf32> to vector<4x8xf32>
      %35 = vector.shape_cast %34 : vector<4x8xf32> to vector<4x8x1xf32>
      %36 = arith.maximumf %33, %35 : vector<4x8x1xf32>
      %c0_23 = arith.constant 0 : index
      %c0_24 = arith.constant 0 : index
      %c0_25 = arith.constant 0 : index
      %37 = vector.load %arg9[%c0_23, %c0_24, %c0_25] : memref<4x8x1xf32, #tpu.memory_space<vmem>>, vector<4x8x1xf32>
      %38 = arith.subf %37, %36 : vector<4x8x1xf32>
      %39 = math.exp %38 : vector<4x8x1xf32>
      %40 = vector.broadcast %36 : vector<4x8x1xf32> to vector<4x8x8xf32>
      %41 = arith.subf %32, %40 : vector<4x8x8xf32>
      %42 = math.exp %41 : vector<4x8x8xf32>
      %c0_26 = arith.constant 0 : index
      %c0_27 = arith.constant 0 : index
      %c0_28 = arith.constant 0 : index
      %43 = vector.load %arg10[%c0_26, %c0_27, %c0_28] : memref<4x8x1xf32, #tpu.memory_space<vmem>>, vector<4x8x1xf32>
      %44 = arith.mulf %39, %43 : vector<4x8x1xf32>
      %cst_29 = arith.constant dense<0.000000e+00> : vector<4x8xf32>
      %45 = vector.multi_reduction <add>, %42, %cst_29 [2] : vector<4x8x8xf32> to vector<4x8xf32>
      %46 = vector.shape_cast %45 : vector<4x8xf32> to vector<4x8x1xf32>
      %47 = arith.addf %44, %46 : vector<4x8x1xf32>
      %c0_30 = arith.constant 0 : index
      %c0_31 = arith.constant 0 : index
      %c0_32 = arith.constant 0 : index
      %48 = vector.load %arg10[%c0_30, %c0_31, %c0_32] : memref<4x8x1xf32, #tpu.memory_space<vmem>>, vector<4x8x1xf32>
      tpu.vector_store %arg10[%c0_30, %c0_31, %c0_32], %47 {strides = array<i32>} : memref<4x8x1xf32, #tpu.memory_space<vmem>>, vector<4x8x1xf32>,
      %c0_33 = arith.constant 0 : index
      %c0_34 = arith.constant 0 : index
      %c0_35 = arith.constant 0 : index
      %49 = vector.load %arg11[%c0_33, %c0_34, %c0_35] : memref<4x8x8xf32, #tpu.memory_space<vmem>>, vector<4x8x8xf32>
      %50 = vector.broadcast %39 : vector<4x8x1xf32> to vector<4x8x8xf32>
      %51 = arith.mulf %50, %49 : vector<4x8x8xf32>
      %52 = arith.truncf %42 : vector<4x8x8xf32> to vector<4x8x8xbf16>
      "tpu.trace_start"() <{level = 10 : i32, message = "hqk,hkd->hqd"}> : () -> ()
      %cst_36 = arith.constant dense<0.000000e+00> : vector<4x8x8xf32>
      %53 = tpu.matmul %52, %17, %cst_36 {dimension_numbers = #tpu.dot_dimension_numbers<[2], [1], [1], [2], [0, 0, 0, 1, 1, 2], [0], [0]>} : vector<4x8x8xbf16>, vector<4x8x8xbf16>, vector<4x8x8xf32> -> vector<4x8x8xf32>
      "tpu.trace_stop"() : () -> ()
      %54 = arith.addf %51, %53 : vector<4x8x8xf32>
      %c0_37 = arith.constant 0 : index
      %c0_38 = arith.constant 0 : index
      %c0_39 = arith.constant 0 : index
      %55 = vector.load %arg11[%c0_37, %c0_38, %c0_39] : memref<4x8x8xf32, #tpu.memory_space<vmem>>, vector<4x8x8xf32>
      tpu.vector_store %arg11[%c0_37, %c0_38, %c0_39], %54 {strides = array<i32>} : memref<4x8x8xf32, #tpu.memory_space<vmem>>, vector<4x8x8xf32>,
      %c0_40 = arith.constant 0 : index
      %c0_41 = arith.constant 0 : index
      %c0_42 = arith.constant 0 : index
      %56 = vector.load %arg9[%c0_40, %c0_41, %c0_42] : memref<4x8x1xf32, #tpu.memory_space<vmem>>, vector<4x8x1xf32>
      tpu.vector_store %arg9[%c0_40, %c0_41, %c0_42], %36 {strides = array<i32>} : memref<4x8x1xf32, #tpu.memory_space<vmem>>, vector<4x8x1xf32>,
    } else {
    }
    %c0_i32_3 = arith.constant 0 : i32
    %9 = arith.cmpi eq, %arg2, %c0_i32_3 : i32
    %10 = arith.extui %9 : i1 to i32
    %c0_i32_4 = arith.constant 0 : i32
    %11 = arith.cmpi ne, %10, %c0_i32_4 : i32
    scf.if %11 {
      %c0 = arith.constant 0 : index
      %c0_5 = arith.constant 0 : index
      %c0_6 = arith.constant 0 : index
      %12 = vector.load %arg11[%c0, %c0_5, %c0_6] : memref<4x8x8xf32, #tpu.memory_space<vmem>>, vector<4x8x8xf32>
      %c0_7 = arith.constant 0 : index
      %c0_8 = arith.constant 0 : index
      %c0_9 = arith.constant 0 : index
      %13 = vector.load %arg10[%c0_7, %c0_8, %c0_9] : memref<4x8x1xf32, #tpu.memory_space<vmem>>, vector<4x8x1xf32>
      %14 = tpu.reciprocal %13 {approx = true} : vector<4x8x1xf32> -> vector<4x8x1xf32>
      %15 = vector.broadcast %14 : vector<4x8x1xf32> to vector<4x8x8xf32>
      %16 = arith.mulf %12, %15 : vector<4x8x8xf32>
      %17 = arith.truncf %16 : vector<4x8x8xf32> to vector<4x8x8xbf16>
      %c0_10 = arith.constant 0 : index
      %c0_11 = arith.constant 0 : index
      %c0_12 = arith.constant 0 : index
      %18 = vector.load %arg6[%c0_10, %c0_11, %c0_12] : memref<4x8x32xbf16, #tpu.memory_space<vmem>>, vector<4x8x32xbf16>
      "tpu.trace_start"() <{level = 10 : i32, message = "hqd,hdn->hqn"}> : () -> ()
      %cst = arith.constant dense<0.000000e+00> : vector<4x8x32xf32>
      %19 = tpu.matmul %17, %18, %cst {dimension_numbers = #tpu.dot_dimension_numbers<[2], [1], [1], [2], [0, 0, 0, 1, 1, 2], [0], [0]>} : vector<4x8x8xbf16>, vector<4x8x32xbf16>, vector<4x8x32xf32> -> vector<4x8x32xf32>
      "tpu.trace_stop"() : () -> ()
      %cst_13 = arith.constant dense<0.000000e+00> : vector<8x32xf32>
      %20 = vector.multi_reduction <add>, %19, %cst_13 [0] : vector<4x8x32xf32> to vector<8x32xf32>
      %c0_14 = arith.constant 0 : index
      %c0_15 = arith.constant 0 : index
      %21 = vector.load %arg7[%c0_14, %c0_15] : memref<1x32xf32, #tpu.memory_space<vmem>>, vector<1x32xf32>
      %22 = vector.broadcast %21 : vector<1x32xf32> to vector<8x32xf32>
      %23 = arith.addf %20, %22 : vector<8x32xf32>
      %c0_16 = arith.constant 0 : index
      %c0_17 = arith.constant 0 : index
      %c0_18 = arith.constant 0 : index
      %24 = vector.load %arg8[%c0_16, %c0_17, %c0_18] : memref<1x8x32xf32, #tpu.memory_space<vmem>>, vector<1x8x32xf32>
      %25 = vector.shape_cast %24 : vector<1x8x32xf32> to vector<8x32xf32>
      %26 = vector.shape_cast %23 : vector<8x32xf32> to vector<1x8x32xf32>
      tpu.vector_store %arg8[%c0_16, %c0_17, %c0_18], %26 {strides = array<i32>} : memref<1x8x32xf32, #tpu.memory_space<vmem>>, vector<1x8x32xf32>,
    } else {
    }
    return
  }
  func.func @transform_0(%arg0: i32, %arg1: i32, %arg2: i32) -> (i32, i32, i32, i32) {
    %c0_i32 = arith.constant 0 : i32
    %c0_i32_0 = arith.constant 0 : i32
    %c0_i32_1 = arith.constant 0 : i32
    return %arg0, %c0_i32, %arg1, %c0_i32_0 : i32, i32, i32, i32
  }
  func.func @transform_1(%arg0: i32, %arg1: i32, %arg2: i32) -> (i32, i32, i32, i32) {
    %c0_i32 = arith.constant 0 : i32
    %c0_i32_0 = arith.constant 0 : i32
    %c0_i32_1 = arith.constant 0 : i32
    return %arg0, %c0_i32, %arg2, %c0_i32_0 : i32, i32, i32, i32
  }
  func.func @transform_2(%arg0: i32, %arg1: i32, %arg2: i32) -> (i32, i32, i32, i32) {
    %c0_i32 = arith.constant 0 : i32
    %c0_i32_0 = arith.constant 0 : i32
    %c0_i32_1 = arith.constant 0 : i32
    return %arg0, %c0_i32, %arg2, %c0_i32_0 : i32, i32, i32, i32
  }
  func.func @transform_3(%arg0: i32, %arg1: i32, %arg2: i32) -> (i32, i32, i32) {
    %c0_i32 = arith.constant 0 : i32
    %c0_i32_0 = arith.constant 0 : i32
    %c0_i32_1 = arith.constant 0 : i32
    %c0_i32_2 = arith.constant 0 : i32
    return %c0_i32, %c0_i32_0, %c0_i32_1 : i32, i32, i32
  }
  func.func @transform_4(%arg0: i32, %arg1: i32, %arg2: i32) -> (i32, i32) {
    %c0_i32 = arith.constant 0 : i32
    %c0_i32_0 = arith.constant 0 : i32
    %c0_i32_1 = arith.constant 0 : i32
    return %c0_i32, %c0_i32_0 : i32, i32
  }
  func.func @transform_5(%arg0: i32, %arg1: i32, %arg2: i32) -> (i32, i32, i32) {
    %c0_i32 = arith.constant 0 : i32
    %c0_i32_0 = arith.constant 0 : i32
    return %arg0, %arg1, %c0_i32 : i32, i32, i32
  }
}

</mosaic_0001>

<bundles_post_ra>
// kernel: rel_multihead_attn_forward.2
= control target key start
LH: loop header
LB: loop body
LE: loop exit
PB: predicated region body
PF: predicated region fallthrough
CT: control target
= control target key end

     0   :  { %s403_s12 = smov 0   ;;  %s405_s13 = smov 0   ;;  %s442_s0 = inlined_call_operand.vmem [shape: f32[2,8,32], index: 0, kind: input, shape index: {}]   ;;  %s443_s1 = inlined_call_operand.vmem [shape: bf16[32,96], index: 1, kind: input, shape index: {}]   ;;  %s444_s2 = inlined_call_operand.vmem [shape: f32[1,96], index: 2, kind: input, shape index: {}]   ;;  %s445_s3 = inlined_call_operand.vmem [shape: bf16[2,8,96], index: 3, kind: output, shape index: {}]  }
   0x1   :  { %s407_s14 = smov 0  }
   0x2 LB: > { %s25_s15 = sadd.s32 1, %s377_s13  ;;  %p318_p0 = scmp.ge.s32.totalorder %s381_s14, 1  ;;  %s381_s14 = sphi %s407_s14, %s13_s14   ;;  %s377_s13 = sphi %s405_s13, %s447_s13   ;;  %s373_s12 = sphi %s403_s12, %s446_s12  }
   0x3   : > { %p27_p1 = scmp.ge.s32.totalorder %s25_s15, 2  ;;  %p155_p2 = scmp.lt.s32.totalorder %s381_s14, 3 }
   0x5   : > { %s449_s15 = smov (%p27_p1, %s25_s15), 0  ;;  %p156_p3 = pnand %p318_p0, %p155_p2 }
   0x6   : > { %p183_p4 = scmp.lt.s32.totalorder (!%p156_p3), %s373_s12, 1 }
   0x7   : > { %159 = sbr.rel (%p156_p3) target bundleno = 154 (0x9a), region = 32 }
   0xc   : > { %v333_v0 = vld [vmem:[%s443_s1 + $0x8] sm:$0xff]  ;;  %v332_v1 = vld [vmem:[%s443_s1] sm:$0xff]  ;;  %s451_s12 = smov (!%p183_p4, %s373_s12), 1  ;;  %vm220_vm0 = vcmask 261120   ;;  %vm238_vm1 = vcmask 781312  }
   0xd   : > { %230 = vmatpush.bf16.msra.mxu0 %v333_v0  ;;  %s319_s20 = sshll.u32 %s451_s12, 3  ;;  %v358_v4 = vld [vmem:[%s444_s2] ss:$0 sm:$0xff]  ;;  %s320_s26 = sshll.u32 %s451_s12, 2 }
   0xe   : > { %s189_s23 = scalar_lea.vmem %s442_s0, %s319_s20  ;;  %s196_s29 = scalar_lea.vmem %s445_s3, %s320_s26 }
   0xf   : > { %v198_v2 = vld [vmem:[%s189_s23] sm:$0xff] }
  0x10   : > { %v199_v3 = vpack.c.bf16 %v198_v2, %v198_v2 }
  0x11   : > { %231 = vmatpush.bf16.msra.mxu0 %v332_v1 }
  0x14   : > { %329 = vmatmul.msk.bf16.vlgmr.msra.gmra.mxu0 %vm220_vm0, %v199_v3 }
  0x91   : > { %v233_v5 = vpop.f32.mrf.mxu0 }
  0x92   : > { %v234_v6 = vadd.f32 %v358_v4, %v233_v5 }
  0x94   : > { %v237_v7 = vpack.c.bf16 %v234_v6, %v234_v6 }
  0x96   : > { %239 = vst.msk [vmem:[%s196_s29] sm:$0xf] %vm238_vm1, %v237_v7 }
  0x99   : > { %v235_v8 = vpop.f32.mrf.mxu0 }
  0x9a PF: > { %s13_s14 = sadd.s32 1, %s381_s14   ;;  %s446_s12 = smov %s377_s13 }
  0x9b   : > { %p10_p5 = scmp.ge.s32.totalorder %s13_s14, 4   ;;  %s447_s13 = smov %s449_s15 }
  0x9d   :  { %12 = sbr.rel (!%p10_p5) target bundleno = 2 (0x2), region = 62 }

// kernel: rel_multihead_attn_forward.3
= control target key start
LH: loop header
LB: loop body
LE: loop exit
PB: predicated region body
PF: predicated region fallthrough
CT: control target
= control target key end

     0   :  { %10 = vsyncpa [#allocation6], 0  ;;  %s1400_s0 = inlined_call_operand.vmem [shape: bf16[2,4,8,8], index: 0, kind: input, shape index: {}]   ;;  %s1401_s1 = inlined_call_operand.vmem [shape: bf16[2,4,8,8], index: 1, kind: input, shape index: {}]   ;;  %s1402_s2 = inlined_call_operand.vmem [shape: bf16[2,4,8,8], index: 2, kind: input, shape index: {}]   ;;  %s1403_s3 = inlined_call_operand.vmem [shape: bf16[4,8,32], index: 3, kind: input, shape index: {}]   ;;  %s1404_s4 = inlined_call_operand.vmem [shape: f32[1,32], index: 4, kind: input, shape index: {}]   ;;  %s1405_s5 = inlined_call_operand.hbm [shape: f32[2,8,32], index: 5, kind: output, shape index: {}]  }
   0x1   :  { %12 = vsyncpa [#allocation6 + $0x1], 0  ;;  %s1160_s18 = smov 0   ;;  %s1162_s19 = smov 0  }
   0x2   :  { %s1164_s20 = smov 0   ;;  %s1166_s21 = smov 0  }
   0x3   :  { %s1168_s22 = smov 0   ;;  %s1170_s23 = smov 0  }
   0x4 LB: > { %s930_s24 = sadd.s32 4294967295, %s1125_s23   ;;  %s931_s25 = sadd.s32 4294967294, %s1125_s23   ;;  %s1125_s23 = sphi %s1170_s23, %s18_s23   ;;  %s1121_s22 = sphi %s1168_s22, %s1412_s22   ;;  %s1117_s21 = sphi %s1166_s21, %s1411_s21   ;;  %s1113_s20 = sphi %s1164_s20, %s1410_s20   ;;  %s1109_s19 = sphi %s1162_s19, %s1409_s19   ;;  %s1105_s18 = sphi %s1160_s18, %s1408_s18  }
   0x5   : > { %s37_s26 = sadd.s32 1, %s1121_s22  ;;  %s172_s27 = sadd.s32 1, %s1113_s20 }
   0x6   : > { %p39_p0 = scmp.ge.s32.totalorder %s37_s26, 2  ;;  %p182_p1 = scmp.ne.s32.totalorder %s1113_s20, %s1109_s19 }
   0x7   : > { %p183_p2 = scmp.eq.s32.totalorder %s930_s24, 1  ;;  %p188_p3 = scmp.ne.s32.totalorder %s1109_s19, %s1105_s18 }
   0x8   : > { %s1414_s26 = smov (%p39_p0, %s37_s26), 0  ;;  %p189_p5 = scmp.eq.s32.totalorder %s931_s25, 1 }
   0x9   : > { %p1200_p4 = por %p183_p2, %p182_p1  ;;  %s167_s29 = ssub.s32 %s1121_s22, %s1414_s26 }
   0xa   : > { %p934_p6 = scmp.ge.s32.totalorder %s1125_s23, 1  ;;  %p170_p7 = scmp.eq.s32.totalorder %s167_s29, 0 }
   0xb   : > { %p1207_p8 = por %p189_p5, %p188_p3  ;;  %p246_p9 = scmp.lt.s32.totalorder %s1125_s23, 3 }
   0xc   : > { %s1213_s6 = scalar_select %p170_p7, %s1113_s20, %s172_s27  }
   0xd   : > { %p247_p10 = pnand %p934_p6, %p246_p9 }
   0xe   : > { %p293_p11 = scmp.lt.s32.totalorder (!%p247_p10), %s1117_s21, 1  ;;  %s955_s13 = sshll.u32 (!%p247_p10), %s1117_s21, 3 }
   0xf   : > { %250 = sbr.rel (%p247_p10) target bundleno = 796 (0x31c), region = 40  ;;  %s812_s16 = scalar_lea.hbm (!%p247_p10), %s1405_s5, %s955_s13 }
  0x10   : > { %s816_s27 = sshll.u32 (!%p247_p10), %s812_s16, 4  ;;  %s817_s27 = int_to_ptr.hbm [resolvable:$true] %s816_s27 }
  0x14   : > { %s294_s7 = scalar_select %p293_p11, %s1117_s21, 1  ;;  %vm331_vm0 = vcmask 64512   ;;  %vm322_vm1 = vcmask 7168   ;;  %v1127_v12 = vmov -inf   ;;  %v432_v13 = vlaneseq }
  0x15   : > { %323 = vst.msk [vmem:[#allocation2] sm:$0xff] %vm322_vm1, %v1127_v12  ;;  %v1128_v32 = vmov 0   ;;  %v1129_v33 = vmov 0.0   ;;  %vm575_vm3 = vcmask 1043456   ;;  %vm786_vm4 = vcmask 261120  }
  0x16   : > { %s1217_s8 = sshll.u32 %s294_s7, 4  ;;  %324 = vst.msk [vmem:[#allocation2 + $0x8] sm:$0xff] %vm322_vm1, %v1127_v12  ;;  %v433_v14 = vshrl.u32 %v432_v13, 7  ;;  %v437_v15 = vand.u32 127, %v432_v13  ;;  %1020 = vset.pattern.permute.xlu0 %v1128_v32  ;;  %1019 = vset.pattern.permute.xlu2 %v1128_v32  ;;  %s1061_s7 = sshra.s32 %s817_s27, 4  ;;  %s1062_s7 = int_to_ptr.hbm [resolvable:$true] %s1061_s7 }
  0x17   : > { %s308_s11 = scalar_lea.vmem %s1401_s1, %s1217_s8  ;;  %s300_s14 = scalar_lea.vmem %s1400_s0, %s1217_s8  ;;  %325 = vst.msk [vmem:[#allocation2 + $0x10] sm:$0xff] %vm322_vm1, %v1127_v12  ;;  %1021 = vset.pattern.permute.xlu1 %v1128_v32 }
  0x18   : > { %v347_v0 = vld [vmem:[%s308_s11] sm:$0xf]  ;;  %v349_v1 = vld [vmem:[%s308_s11 + $0x8] sm:$0xf]  ;;  %v348_v4 = vld [vmem:[%s308_s11 + $0x4] sm:$0xf]  ;;  %vm440_vm2 = vcmp.le.s32.totalorder %v437_v15, %v433_v14  ;;  %s316_s17 = scalar_lea.vmem %s1402_s2, %s1217_s8  ;;  %p1068_p1 = scmp.lt.s32.totalorder %s1062_s7, %s1405_s5 }
  0x19   : > { %v360_v2 = vsel %vm331_vm0, %v347_v0, 0  ;;  %v398_v3 = vsel %vm331_vm0, %v349_v1, 0  ;;  %v379_v5 = vsel %vm331_vm0, %v348_v4, 0  ;;  %v350_v6 = vld [vmem:[%s308_s11 + $0xc] sm:$0xf]  ;;  %326 = vst.msk [vmem:[#allocation2 + $0x18] sm:$0xff] %vm322_vm1, %v1127_v12 }
  0x1a   : > { %369 = vmatpush.bf16.xpose.msra.mxu0 %v360_v2  ;;  %407 = vmatpush.bf16.xpose.msra.mxu2 %v398_v3  ;;  %v417_v7 = vsel %vm331_vm0, %v350_v6, 0  ;;  %v343_v8 = vld [vmem:[%s300_s14] sm:$0xf]  ;;  %v345_v9 = vld [vmem:[%s300_s14 + $0x8] sm:$0xf]  ;;  %329 = vst.msk [vmem:[#allocation3 + $0x10] sm:$0xff] %vm322_vm1, %v1129_v33 }
  0x1b   : > { %388 = vmatpush.bf16.xpose.msra.mxu1 %v379_v5  ;;  %426 = vmatpush.bf16.xpose.msra.mxu3 %v417_v7  ;;  %v344_v10 = vld [vmem:[%s300_s14 + $0x4] sm:$0xf]  ;;  %v346_v11 = vld [vmem:[%s300_s14 + $0xc] sm:$0xf]  ;;  %327 = vst.msk [vmem:[#allocation3] sm:$0xff] %vm322_vm1, %v1129_v33  ;;  %s290_s11 = sand.u32 1, %s1109_s19  }
  0x1c   : > { %328 = vst.msk [vmem:[#allocation3 + $0x8] sm:$0xff] %vm322_vm1, %v1129_v33  ;;  %v1267_v34 = vld [vmem:[#allocation2] sm:$0xff]  ;;  %v353_v50 = vld [vmem:[%s316_s17 + $0x8] sm:$0xf]  ;;  %v354_v52 = vld [vmem:[%s316_s17 + $0xc] sm:$0xf] }
  0x1d   : > { %330 = vst.msk [vmem:[#allocation3 + $0x18] sm:$0xff] %vm322_vm1, %v1129_v33  ;;  %v1279_v40 = vld [vmem:[#allocation2 + $0x8] sm:$0xff]  ;;  %v615_v51 = vsel %vm575_vm3, %v353_v50, 0  ;;  %v634_v53 = vsel %vm575_vm3, %v354_v52, 0  ;;  %v351_v54 = vld [vmem:[%s316_s17] sm:$0xf] }
  0x1e   : > { %332 = vst.msk [vmem:[#allocation4] sm:$0xff] %vm331_vm0, %v1129_v33  ;;  %v1277_v38 = vld [vmem:[#allocation2 + $0x10] sm:$0xff]  ;;  %v577_v55 = vsel %vm575_vm3, %v351_v54, 0  ;;  %v352_v57 = vld [vmem:[%s316_s17 + $0x4] sm:$0xf]  ;;  %s935_s12 = sshll.u32 %s290_s11, 3 }
  0x1f   : > { %333 = vst.msk [vmem:[#allocation4 + $0x8] sm:$0xff] %vm331_vm0, %v1129_v33  ;;  %v596_v59 = vsel %vm575_vm3, %v352_v57, 0  ;;  %s292_s21 = scalar_lea.vmem [#allocation5], %s935_s12  ;;  %s801_s29 = scalar_lea.sflag [#allocation6], %s290_s11 }
  0x20   : > { %334 = vst.msk [vmem:[#allocation4 + $0x10] sm:$0xff] %vm331_vm0, %v1129_v33  ;;  %v450_v46 = vld [vmem:[#allocation2 + $0x18] sm:$0xff]  ;;  %s814_s25 = sshll.u32 %s292_s21, 4  ;;  %s1063_s8 = scalar_lea.hbm %s1062_s7, 8  ;;  %s815_s25 = int_to_ptr.vmem [resolvable:$true] %s814_s25 }
  0x21   : > { %942 = vmatmul.msk.bf16.vlgmr.msra.gmra.mxu0 %vm331_vm0, %v343_v8  ;;  %944 = vmatmul.msk.bf16.vlgmr.msra.gmra.mxu2 %vm331_vm0, %v345_v9  ;;  %335 = vst.msk [vmem:[#allocation4 + $0x18] sm:$0xff] %vm331_vm0, %v1129_v33  ;;  %p1064_p12 = scmp.ne.s32.totalorder %s1062_s7, %s1063_s8  ;;  %s1067_s12 = scalar_lea.hbm %s1405_s5, 16 }
  0x22   : > { %943 = vmatmul.msk.bf16.vlgmr.msra.gmra.mxu1 %vm331_vm0, %v344_v10  ;;  %945 = vmatmul.msk.bf16.vlgmr.msra.gmra.mxu3 %vm331_vm0, %v346_v11  ;;  %p1069_p2 = scmp.lt.s32.totalorder %s1067_s12, %s1063_s8 }
  0x23   : > { %624 = vmatpush.bf16.msrb.mxu2 %v615_v51  ;;  %643 = vmatpush.bf16.msrb.mxu3 %v634_v53  ;;  %p1065_p13 = pnand %p1064_p12, %p1200_p4 }
  0x24   : > { %586 = vmatpush.bf16.msrb.mxu0 %v577_v55  ;;  %605 = vmatpush.bf16.msrb.mxu1 %v596_v59  ;;  %p1070_p3 = por %p1069_p2, %p1068_p1 }
  0x25   : > { %p1066_p0 = pneg %p1065_p13 }
  0x27   : > { %v542_v53 = vld [vmem:[#allocation4 + $0x10] sm:$0xff]  ;;  %p1071_p5 = pnand %p1070_p3, %p1066_p0 }
  0x28   : > { %v543_v51 = vld [vmem:[#allocation4 + $0x18] sm:$0xff] }
  0x9e   : > { %v371_v16 = vpop.f32.mrf.mxu0 }
  0x9f   : > { %v1240_v17 = vsel %vm440_vm2, %v371_v16, -1e+30  ;;  %v390_v18 = vpop.f32.mrf.mxu1 }
  0xa0   : > { %v451_v19 = vsel %vm331_vm0, %v1240_v17, -inf  ;;  %v1245_v20 = vsel %vm440_vm2, %v390_v18, -1e+30 }
  0xa1   : > { %452 = vmax.xlane.f32.xlu1 %v451_v19  ;;  %v454_v25 = vsel %vm331_vm0, %v1245_v20, -inf }
  0xa4   : > { %v409_v21 = vpop.f32.mrf.mxu2 }
  0xa5   : > { %v1248_v22 = vsel %vm440_vm2, %v409_v21, -1e+30  ;;  %v428_v26 = vpop.f32.mrf.mxu3 }
  0xa6   : > { %v373_v23 = vpop.f32.mrf.mxu0  ;;  %v457_v24 = vsel %vm331_vm0, %v1248_v22, -inf  ;;  %v1255_v28 = vsel %vm440_vm2, %v428_v26, -1e+30  ;;  %v513_v26 = vld [vmem:[#allocation3 + $0x10] sm:$0xff] }
  0xa7   : > { %458 = vmax.xlane.f32.xlu0 %v457_v24  ;;  %v392_v27 = vpop.f32.mrf.mxu1  ;;  %v460_v29 = vsel %vm331_vm0, %v1255_v28, -inf }
  0xa9   : > { %455 = vmax.xlane.f32.xlu1 %v454_v25 }
  0xac   : > { %v411_v30 = vpop.f32.mrf.mxu2 }
  0xad   : > { %v430_v31 = vpop.f32.mrf.mxu3  ;;  %v514_v30 = vld [vmem:[#allocation3 + $0x18] sm:$0xff] }
  0xaf   : > { %461 = vmax.xlane.f32.xlu0 %v460_v29 }
 0x114   : > { %v453_v35 = vpop.xlane.xlu1 %452 }
 0x115   : > { %v1270_v36 = vmax.f32 %v1267_v34, %v453_v35  ;;  %v511_v35 = vld [vmem:[#allocation3] sm:$0xff] }
 0x117   : > { %v467_v37 = vsub.f32 %v1267_v34, %v1270_v36  ;;  %657 = vst.msk [vmem:[#allocation2] sm:$0xff] %vm322_vm1, %v1270_v36  ;;  %481 = vperm.xlu0 %1020, %v1270_v36  }
 0x119   : > { %v471_v21 = vmul.f32 1.442695, %v467_v37 }
 0x11a   : > { %v459_v39 = vpop.xlane.xlu0 %458 }
 0x11b   : > { %v1282_v41 = vmax.f32 %v1277_v38, %v459_v39 }
 0x11c   : > { %v456_v42 = vpop.xlane.xlu1 %455 }
 0x11d   : > { %v469_v43 = vsub.f32 %v1277_v38, %v1282_v41  ;;  %659 = vst.msk [vmem:[#allocation2 + $0x10] sm:$0xff] %vm322_vm1, %v1282_v41  ;;  %v1289_v44 = vmax.f32 %v1279_v40, %v456_v42  ;;  %491 = vperm.xlu2 %1019, %v1282_v41   ;;  %v512_v42 = vld [vmem:[#allocation3 + $0x8] sm:$0xff] }
 0x11f   : > { %v468_v45 = vsub.f32 %v1279_v40, %v1289_v44  ;;  %658 = vst.msk [vmem:[#allocation2 + $0x8] sm:$0xff] %vm322_vm1, %v1289_v44  ;;  %486 = vperm.xlu1 %1021, %v1289_v44  }
 0x121   : > { %v473_v23 = vmul.f32 1.442695, %v468_v45 }
 0x122   : > { %v462_v47 = vpop.xlane.xlu0 %461 }
 0x123   : > { %v466_v48 = vmax.f32 %v450_v46, %v462_v47 }
 0x125   : > { %v470_v49 = vsub.f32 %v450_v46, %v466_v48  ;;  %660 = vst.msk [vmem:[#allocation2 + $0x18] sm:$0xff] %vm322_vm1, %v466_v48  ;;  %496 = vperm.xlu2 %1019, %v466_v48  }
 0x127   : > { %v477_v15 = vmul.f32 1.442695, %v470_v49 }
 0x177   : > { %v492_v56 = vpop.permute.xlu2 %491 }
 0x178   : > { %v501_v58 = vsub.f32 %v1248_v22, %v492_v56 }
 0x17a   : > { %v507_v60 = vmul.f32 1.442695, %v501_v58 }
 0x17c   : > { %1023 = vpow2.f32 %v507_v60 }
 0x17f   : > { %v497_v61 = vpop.permute.xlu2 %496 }
 0x180   : > { %v502_v62 = vsub.f32 %v1255_v28, %v497_v61 }
 0x182   : > { %v1024_v63 = vpop.eup %1023  ;;  %v509_v0 = vmul.f32 1.442695, %v502_v62 }
 0x183   : > { %v525_v1 = vsel %vm331_vm0, %v1024_v63, 0.0  ;;  %v570_v2 = vpack.c.bf16 %v1024_v63, %v1024_v63 }
 0x184   : > { %1025 = vpow2.f32 %v509_v0  ;;  %526 = vadd.xlane.f32.xlu2 %v525_v1  ;;  %v540_v0 = vld [vmem:[#allocation4] sm:$0xff] }
 0x185   : > { %948 = vmatmul.msk.bf16.vlgmr.msrb.gmra.mxu2 %vm331_vm0, %v570_v2 }
 0x189   : > { %v482_v3 = vpop.permute.xlu0 %481 }
 0x18a   : > { %v1026_v4 = vpop.eup %1025  ;;  %v499_v5 = vsub.f32 %v1240_v17, %v482_v3 }
 0x18b   : > { %v528_v6 = vsel %vm331_vm0, %v1026_v4, 0.0  ;;  %v571_v7 = vpack.c.bf16 %v1026_v4, %v1026_v4 }
 0x18c   : > { %v503_v8 = vmul.f32 1.442695, %v499_v5  ;;  %529 = vadd.xlane.f32.xlu1 %v528_v6  ;;  %v541_v6 = vld [vmem:[#allocation4 + $0x8] sm:$0xff] }
 0x18d   : > { %949 = vmatmul.msk.bf16.vlgmr.msrb.gmra.mxu3 %vm331_vm0, %v571_v7 }
 0x18e   : > { %1027 = vpow2.f32 %v503_v8 }
 0x191   : > { %v487_v9 = vpop.permute.xlu1 %486 }
 0x192   : > { %v500_v10 = vsub.f32 %v1245_v20, %v487_v9  ;;  %v475_v20 = vmul.f32 1.442695, %v469_v43 }
 0x194   : > { %v1028_v11 = vpop.eup %1027  ;;  %v505_v12 = vmul.f32 1.442695, %v500_v10  ;;  %v707_v10 = vld [vmem:[%s1403_s3 + $0xc] sm:$0xf] }
 0x195   : > { %v519_v13 = vsel %vm331_vm0, %v1028_v11, 0.0  ;;  %v568_v14 = vpack.c.bf16 %v1028_v11, %v1028_v11  ;;  %v771_v11 = vsel %vm575_vm3, %v707_v10, 0 }
 0x196   : > { %1029 = vpow2.f32 %v505_v12  ;;  %520 = vadd.xlane.f32.xlu0 %v519_v13  ;;  %780 = vmatpush.bf16.msra.mxu3 %v771_v11  ;;  %v706_v12 = vld [vmem:[%s1403_s3 + $0x8] sm:$0xf] }
 0x197   : > { %946 = vmatmul.msk.bf16.vlgmr.msrb.gmra.mxu0 %vm331_vm0, %v568_v14  ;;  %1031 = vpow2.f32 %v477_v15  ;;  %v752_v13 = vsel %vm575_vm3, %v706_v12, 0  ;;  %v705_v14 = vld [vmem:[%s1403_s3 + $0x4] sm:$0xf] }
 0x198   : > { %1033 = vpow2.f32 %v475_v20  ;;  %761 = vmatpush.bf16.msra.mxu2 %v752_v13  ;;  %v733_v15 = vsel %vm575_vm3, %v705_v14, 0 }
 0x199   : > { %1035 = vpow2.f32 %v471_v21  ;;  %742 = vmatpush.bf16.msra.mxu1 %v733_v15 }
 0x19a   : > { %1037 = vpow2.f32 %v473_v23 }
 0x19c   : > { %v1030_v16 = vpop.eup %1029 }
 0x19d   : > { %v522_v17 = vsel %vm331_vm0, %v1030_v16, 0.0  ;;  %v569_v18 = vpack.c.bf16 %v1030_v16, %v1030_v16  ;;  %v1032_v19 = vpop.eup %1031  ;;  %v704_v16 = vld [vmem:[%s1403_s3] sm:$0xf] }
 0x19e   : > { %523 = vadd.xlane.f32.xlu2 %v522_v17  ;;  %v1034_v22 = vpop.eup %1033  ;;  %v518_v31 = vmul.f32 %v1032_v19, %v514_v30  ;;  %v714_v17 = vsel %vm575_vm3, %v704_v16, 0 }
 0x19f   : > { %947 = vmatmul.msk.bf16.vlgmr.msrb.gmra.mxu1 %vm331_vm0, %v569_v18  ;;  %v1036_v24 = vpop.eup %1035  ;;  %v517_v27 = vmul.f32 %v1034_v22, %v513_v26  ;;  %723 = vmatpush.bf16.msra.mxu0 %v714_v17 }
 0x1a0   : > { %v1038_v25 = vpop.eup %1037  ;;  %v515_v38 = vmul.f32 %v1036_v24, %v511_v35 }
 0x1a1   : > { %v516_v46 = vmul.f32 %v1038_v25, %v512_v42 }
 0x1a5   : > { %561 = vperm.xlu1 %1021, %v1032_v19  }
 0x1b6   : > { %556 = vperm.xlu2 %1019, %v1034_v22  }
 0x1be   : > { %546 = vperm.xlu2 %1019, %v1036_v24  }
 0x1c6   : > { %551 = vperm.xlu2 %1019, %v1038_v25  }
 0x1f7   : > { %v527_v28 = vpop.xlane.xlu2 %526 }
 0x1f8   : > { %v533_v29 = vadd.f32 %v527_v28, %v517_v27 }
 0x1fa   : > { %538 = vst.msk [vmem:[#allocation3 + $0x10] sm:$0xff] %vm322_vm1, %v533_v29 }
 0x1ff   : > { %v530_v32 = vpop.xlane.xlu1 %529 }
 0x200   : > { %v534_v33 = vadd.f32 %v530_v32, %v518_v31 }
 0x201   : > { %v670_v34 = vld [vmem:[#allocation3 + $0x10] sm:$0xff] }
 0x202   : > { %539 = vst.msk [vmem:[#allocation3 + $0x18] sm:$0xff] %vm322_vm1, %v534_v33  ;;  %1039 = vrcp.f32 %v670_v34 }
 0x208   : > { %v1040_v36 = vpop.eup %1039  ;;  %v626_v37 = vpop.f32.mrf.mxu2 }
 0x209   : > { %688 = vperm.xlu0 %1020, %v1040_v36   ;;  %v521_v39 = vpop.xlane.xlu0 %520  ;;  %v671_v40 = vld [vmem:[#allocation3 + $0x18] sm:$0xff] }
 0x20a   : > { %v531_v41 = vadd.f32 %v521_v39, %v515_v38  ;;  %1041 = vrcp.f32 %v671_v40 }
 0x20c   : > { %536 = vst.msk [vmem:[#allocation3] sm:$0xff] %vm322_vm1, %v531_v41 }
 0x210   : > { %v1042_v43 = vpop.eup %1041  ;;  %v628_v44 = vpop.f32.mrf.mxu2 }
 0x211   : > { %v645_v45 = vpop.f32.mrf.mxu3  ;;  %v524_v47 = vpop.xlane.xlu2 %523  ;;  %693 = vperm.xlu2 %1019, %v1042_v43  }
 0x212   : > { %v532_v48 = vadd.f32 %v524_v47, %v516_v46  ;;  %v1022_v46 = vld [vmem:[%s1404_s4] ss:$0 sm:$0xff] }
 0x213   : > { %v668_v49 = vld [vmem:[#allocation3] sm:$0xff] }
 0x214   : > { %537 = vst.msk [vmem:[#allocation3 + $0x8] sm:$0xff] %vm322_vm1, %v532_v48  ;;  %v588_v50 = vpop.f32.mrf.mxu0  ;;  %1043 = vrcp.f32 %v668_v49 }
 0x217   : > { %v562_v52 = vpop.permute.xlu1 %561 }
 0x218   : > { %v567_v54 = vmul.f32 %v562_v52, %v543_v51 }
 0x219   : > { %v647_v55 = vpop.f32.mrf.mxu3  ;;  %v557_v56 = vpop.permute.xlu2 %556 }
 0x21a   : > { %v1044_v57 = vpop.eup %1043  ;;  %v652_v58 = vadd.f32 %v645_v45, %v567_v54  ;;  %v566_v59 = vmul.f32 %v557_v56, %v542_v53 }
 0x21b   : > { %678 = vperm.xlu1 %1021, %v1044_v57   ;;  %v669_v60 = vld [vmem:[#allocation3 + $0x8] sm:$0xff] }
 0x21c   : > { %656 = vst.msk [vmem:[#allocation4 + $0x18] sm:$0xff] %vm331_vm0, %v652_v58  ;;  %v651_v61 = vadd.f32 %v626_v37, %v566_v59  ;;  %v590_v62 = vpop.f32.mrf.mxu0  ;;  %v607_v63 = vpop.f32.mrf.mxu1  ;;  %1045 = vrcp.f32 %v669_v60 }
 0x21e   : > { %655 = vst.msk [vmem:[#allocation4 + $0x10] sm:$0xff] %vm331_vm0, %v651_v61 }
 0x221   : > { %v547_v1 = vpop.permute.xlu2 %546 }
 0x222   : > { %v1046_v2 = vpop.eup %1045  ;;  %v564_v3 = vmul.f32 %v547_v1, %v540_v0 }
 0x223   : > { %683 = vperm.xlu2 %1019, %v1046_v2   ;;  %v667_v18 = vld [vmem:[#allocation4 + $0x18] sm:$0xff] }
 0x224   : > { %v649_v4 = vadd.f32 %v588_v50, %v564_v3  ;;  %v609_v5 = vpop.f32.mrf.mxu1 }
 0x225   : > { %v666_v23 = vld [vmem:[#allocation4 + $0x10] sm:$0xff] }
 0x226   : > { %653 = vst.msk [vmem:[#allocation4] sm:$0xff] %vm331_vm0, %v649_v4 }
 0x229   : > { %v552_v7 = vpop.permute.xlu2 %551 }
 0x22a   : > { %v565_v8 = vmul.f32 %v552_v7, %v541_v6 }
 0x22c   : > { %v650_v9 = vadd.f32 %v607_v63, %v565_v8 }
 0x22d   : > { %v664_v31 = vld [vmem:[#allocation4] sm:$0xff] }
 0x22e   : > { %654 = vst.msk [vmem:[#allocation4 + $0x8] sm:$0xff] %vm331_vm0, %v650_v9 }
 0x235   : > { %v665_v25 = vld [vmem:[#allocation4 + $0x8] sm:$0xff] }
 0x26b   : > { %v694_v19 = vpop.permute.xlu2 %693 }
 0x26c   : > { %v699_v20 = vmul.f32 %v694_v19, %v667_v18 }
 0x26e   : > { %v703_v21 = vpack.c.bf16 %v699_v20, %v699_v20 }
 0x270   : > { %953 = vmatmul.msk.bf16.vlgmr.msra.gmra.mxu3 %vm331_vm0, %v703_v21 }
 0x27b   : > { %v689_v22 = vpop.permute.xlu0 %688 }
 0x27c   : > { %v698_v24 = vmul.f32 %v689_v22, %v666_v23 }
 0x27d   : > { %v684_v26 = vpop.permute.xlu2 %683 }
 0x27e   : > { %v702_v27 = vpack.c.bf16 %v698_v24, %v698_v24  ;;  %v697_v28 = vmul.f32 %v684_v26, %v665_v25 }
 0x280   : > { %v701_v29 = vpack.c.bf16 %v697_v28, %v697_v28  ;;  %952 = vmatmul.msk.bf16.vlgmr.msra.gmra.mxu2 %vm331_vm0, %v702_v27 }
 0x282   : > { %951 = vmatmul.msk.bf16.vlgmr.msra.gmra.mxu1 %vm331_vm0, %v701_v29 }
 0x28d   : > { %v679_v30 = vpop.permute.xlu1 %678 }
 0x28e   : > { %v696_v32 = vmul.f32 %v679_v30, %v664_v31 }
 0x290   : > { %v700_v33 = vpack.c.bf16 %v696_v32, %v696_v32 }
 0x292   : > { %950 = vmatmul.msk.bf16.vlgmr.msra.gmra.mxu0 %vm331_vm0, %v700_v33 }
 0x2f3   : > { %v782_v34 = vpop.f32.mrf.mxu3 }
 0x2f4   : > { %v792_v47 = vsel %vm786_vm4, %v782_v34, 0.0 }
 0x2fb   : > { %v784_v35 = vpop.f32.mrf.mxu3 }
 0x2ff   : > { %v744_v36 = vpop.f32.mrf.mxu1 }
 0x300   : > { %v788_v41 = vsel %vm786_vm4, %v744_v36, 0.0 }
 0x303   : > { %v763_v37 = vpop.f32.mrf.mxu2 }
 0x304   : > { %v790_v44 = vsel %vm786_vm4, %v763_v37, 0.0 }
 0x307   : > { %v746_v38 = vpop.f32.mrf.mxu1 }
 0x30b   : > { %v765_v39 = vpop.f32.mrf.mxu2 }
 0x30f   : > { %v725_v40 = vpop.f32.mrf.mxu0 }
 0x310   : > { %v787_v42 = vsel %vm786_vm4, %v725_v40, 0.0 }
 0x311   : > { %v789_v43 = vadd.f32 %v788_v41, %v787_v42 }
 0x313   : > { %v791_v45 = vadd.f32 %v790_v44, %v789_v43 }
 0x315   : > { %v793_v48 = vadd.f32 %v792_v47, %v791_v45 }
 0x317   : > { %v798_v49 = vadd.f32 %v1022_v46, %v793_v48  ;;  %v727_v50 = vpop.f32.mrf.mxu0 }
 0x319   : > { %799 = vst.msk [vmem:[%s292_s21] sm:$0xff] %vm786_vm4, %v798_v49 }
 0x31a   : > { %1074 = shalt.err (!%p1071_p5)
}
 0x31b   : > { %961 = dma.vmem_to_hbm [thread:$0]  (%p1200_p4), %s815_s25, 128, %s817_s27, %s801_s29  }
 0x31c PF: > { %p967_p6 = scmp.ge.s32.totalorder %s1125_s23, 2  ;;  %s828_s11 = sand.u32 1, %s1105_s18  }
 0x31d   : > { %s829_s15 = scalar_lea.sflag [#allocation6], %s828_s11 }
 0x31e   : > { %p964_p7 = pnand %p967_p6, %p1207_p8 }
 0x320   : > { %p965_p9 = pneg %p964_p7 }
 0x322   : > { %1100 = dma.done.wait (%p965_p9), %s829_s15, 128  }
 0x323   : > { %1102 = vsyncadd (%p965_p9), %s829_s15, 4294967168  ;;  %s18_s23 = sadd.s32 1, %s1125_s23   ;;  %s1408_s18 = smov %s1109_s19 }
 0x324   : > { %p15_p10 = scmp.ge.s32.totalorder %s18_s23, 4   ;;  %s1409_s19 = smov %s1113_s20 }
 0x325   : > { %s1410_s20 = smov %s1213_s6  ;;  %s1411_s21 = smov %s1121_s22 }
 0x326   : > { %s1412_s22 = smov %s1414_s26  ;;  %17 = sbr.rel (!%p15_p10) target bundleno = 4 (0x4), region = 93 }
 0x32b   :  { %835 = vsyncpa [#allocation6], 1 }
 0x32c   :  { %837 = vsyncpa [#allocation6 + $0x1], 1 }

</bundles_post_ra>
